<compile_context>
chip_gen: v7x
topology: tpu7x:2x2x1
jax: 0.10.0
libtpu: 0.0.40
codegen_flags: <defaults>
</compile_context>

<pallas_src>
import math

import jax
import jax.numpy as jnp
from jax.experimental import pallas as pl
from jax.experimental.pallas import tpu as pltpu


def _encoder_kernel(x_ref, mu_ref, sigma_ref, wblk_ref, bblk_ref, out_ref):
    # x_ref / mu_ref / sigma_ref : (tm, k)          -- k tokens packed per row
    # wblk_ref                   : (k, k*d_model)   -- block-diag alpha * W
    # bblk_ref                   : (k, k*d_model)   -- block-diag (beta * W + b)
    # out_ref                    : (tm, k*d_model)  -- lane-dense output slab
    x = x_ref[...]
    x_norm = (x - mu_ref[...]) / jnp.maximum(sigma_ref[...], 1e-6)   # clamp(sigma)
    valid = (x != -1.0).astype(jnp.float32)                          # fused masked_fill
    out_ref[...] = (
        jnp.dot(x_norm * valid, wblk_ref[...], preferred_element_type=jnp.float32)
        + jnp.dot(valid, bblk_ref[...], preferred_element_type=jnp.float32)
    )


def _round_up(a, b):
    return ((a + b - 1) // b) * b


def continuous_encoder_forward(x, mu, sigma, weight, bias, alpha, beta, *, tm=1024):
    """x, mu, sigma: (B, S, 1) f32.  weight: (d_model, 1), bias: (d_model,).
    Returns (x_encoded (B, S, 1, d_model), alpha, beta) like the PyTorch module."""
    B, S, _ = x.shape
    d_model = weight.shape[0]
    N = B * S

    # Lane-packing factor: pack k tokens per 128-lane output row when d_model | 128.
    k = 128 // d_model if (d_model <= 128 and 128 % d_model == 0) else 1
    lane_w = k * d_model

    # Row tiling on packed rows; pad so the 1-D grid divides exactly.
    R = _round_up(pl.cdiv(N, k), 8)          # sublane-aligned packed-row count
    tm_eff = min(tm, R)                      # shrink tile for tiny problems
    R_pad = _round_up(R, tm_eff)
    N_pad = R_pad * k

    def _packed(a):
        flat = a.reshape(N).astype(jnp.float32)
        if N_pad != N:
            flat = jnp.pad(flat, (0, N_pad - N))   # zero pad: sigma=0 -> clamped, safe
        return flat.reshape(R_pad, k)

    x2, mu2, sigma2 = _packed(x), _packed(mu), _packed(sigma)

    # Fold alpha/beta into the Linear(1, d_model) layer (O(d_model) wrapper work) and
    # build block-diagonal (k, k*d_model) matrices for the in-kernel lane broadcast.
    w_col = weight.reshape(d_model).astype(jnp.float32)
    a_s = alpha.reshape(()).astype(jnp.float32)
    b_s = beta.reshape(()).astype(jnp.float32)
    w_eff = a_s * w_col                                   # (d_model,)
    b_eff = b_s * w_col + bias.reshape(d_model)           # (d_model,)
    eye_k = jnp.eye(k, dtype=jnp.float32)
    wblk = jnp.kron(eye_k, w_eff.reshape(1, d_model))     # (k, k*d_model)
    bblk = jnp.kron(eye_k, b_eff.reshape(1, d_model))     # (k, k*d_model)

    row_spec = pl.BlockSpec((tm_eff, k), lambda i: (i, 0))
    mat_spec = pl.BlockSpec((k, lane_w), lambda i: (0, 0))

    out = pl.pallas_call(
        _encoder_kernel,
        out_shape=jax.ShapeDtypeStruct((R_pad, lane_w), jnp.float32),
        grid_spec=pltpu.PrefetchScalarGridSpec(
            num_scalar_prefetch=0,
            grid=(R_pad // tm_eff,),
            in_specs=[row_spec, row_spec, row_spec, mat_spec, mat_spec],
            out_specs=pl.BlockSpec((tm_eff, lane_w), lambda i: (i, 0)),
        ),
        compiler_params=pltpu.CompilerParams(
            dimension_semantics=("parallel",)),
    )(x2, mu2, sigma2, wblk, bblk)

    x_encoded = out.reshape(R_pad * k, d_model)[:N].reshape(B, S, 1, d_model)
    return x_encoded, alpha, beta


def _reference_forward(x, mu, sigma, weight, bias, alpha, beta):
    """Plain-JAX replica of the PyTorch forward, for checking."""
    missing_mask = (x == -1.0)                                  # (B,S,1)
    denom = jnp.maximum(sigma, 1e-6)
    x_norm = (x - mu) / denom
    x_proj = x_norm * alpha + beta                              # (B,S,1)
    B, S, _ = x_proj.shape
    flat = x_proj.reshape(-1, 1)
    enc = flat @ weight.T + bias                                # (B*S, d_model)
    enc = enc.reshape(B, S, 1, -1)
    enc = jnp.where(missing_mask[..., None], 0.0, enc)
    return enc, alpha, beta


def _run_case(key, B, S, d_model, tm=1024):
    k_x, k_mu, k_sig, k_w, k_b = jax.random.split(key, 5)
    x = jax.random.normal(k_x, (B, S, 1), dtype=jnp.float32)
    # sprinkle some "missing" (-1) entries to exercise the mask
    x = x.at[0, 0, 0].set(-1.0).at[B - 1, S // 2, 0].set(-1.0)
    mu = jax.random.normal(k_mu, (B, S, 1), dtype=jnp.float32) * 0.1
    sigma = jnp.abs(jax.random.normal(k_sig, (B, S, 1), dtype=jnp.float32)) + 0.5

    bound = 1.0 / math.sqrt(1.0)
    weight = jax.random.uniform(k_w, (d_model, 1), jnp.float32, -bound, bound)
    bias = jax.random.uniform(k_b, (d_model,), jnp.float32, -bound, bound)
    alpha = jnp.full((1,), 1.25, dtype=jnp.float32)
    beta = jnp.full((1,), -0.5, dtype=jnp.float32)

    x_enc, a_out, b_out = continuous_encoder_forward(
        x, mu, sigma, weight, bias, alpha, beta, tm=tm)
    jax.block_until_ready(x_enc)

    ref_enc, _, _ = _reference_forward(x, mu, sigma, weight, bias, alpha, beta)
    assert x_enc.shape == (B, S, 1, d_model)
    assert jnp.allclose(x_enc, ref_enc, atol=1e-5, rtol=1e-5)
    assert jnp.allclose(a_out, alpha) and jnp.allclose(b_out, beta)


if __name__ == "__main__":
    key = jax.random.PRNGKey(0)
    k1, k2 = jax.random.split(key, 2)

    # Small shape matching the module spec (batch=2, seq=8, d_model=32).
    _run_case(k1, B=2, S=8, d_model=32)

    # Larger, non-divisible shape: exercises padding + multi-step grid with tm=1024.
    _run_case(k2, B=4, S=2053, d_model=32)

    print("KERNEL_OK")
</pallas_src>

<mosaic_0001>
module attributes {stable_mosaic.version = 11 : i64} {
  func.func @_encoder_kernel(%arg0: i32, %arg1: memref<8x4xf32, #tpu.memory_space<vmem>>, %arg2: memref<8x4xf32, #tpu.memory_space<vmem>>, %arg3: memref<8x4xf32, #tpu.memory_space<vmem>>, %arg4: memref<4x128xf32, #tpu.memory_space<vmem>>, %arg5: memref<4x128xf32, #tpu.memory_space<vmem>>, %arg6: memref<8x128xf32, #tpu.memory_space<vmem>>) attributes {dimension_semantics = [#tpu.dimension_semantics<parallel>], iteration_bounds = array<i64: 1>, scalar_prefetch = 0 : i64, scratch_operands = 0 : i64, tpu.core_type = #tpu.core_type<tc>, window_params = [{transform_indices = @transform_0, window_bounds = array<i64: 8, 4>}, {transform_indices = @transform_1, window_bounds = array<i64: 8, 4>}, {transform_indices = @transform_2, window_bounds = array<i64: 8, 4>}, {pipeline_mode = #tpu.pipeline_mode<synchronous>, transform_indices = @transform_3, window_bounds = array<i64: 4, 128>}, {pipeline_mode = #tpu.pipeline_mode<synchronous>, transform_indices = @transform_4, window_bounds = array<i64: 4, 128>}, {transform_indices = @transform_5, window_bounds = array<i64: 8, 128>}]} {
    %c0 = arith.constant 0 : index
    %c0_0 = arith.constant 0 : index
    %0 = vector.load %arg1[%c0, %c0_0] : memref<8x4xf32, #tpu.memory_space<vmem>>, vector<8x4xf32>
    %c0_1 = arith.constant 0 : index
    %c0_2 = arith.constant 0 : index
    %1 = vector.load %arg2[%c0_1, %c0_2] : memref<8x4xf32, #tpu.memory_space<vmem>>, vector<8x4xf32>
    %2 = arith.subf %0, %1 : vector<8x4xf32>
    %c0_3 = arith.constant 0 : index
    %c0_4 = arith.constant 0 : index
    %3 = vector.load %arg3[%c0_3, %c0_4] : memref<8x4xf32, #tpu.memory_space<vmem>>, vector<8x4xf32>
    %cst = arith.constant 9.99999997E-7 : f32
    %4 = vector.broadcast %cst : f32 to vector<8x4xf32>
    %5 = arith.maximumf %3, %4 : vector<8x4xf32>
    %6 = arith.divf %2, %5 : vector<8x4xf32>
    %cst_5 = arith.constant -1.000000e+00 : f32
    %7 = vector.broadcast %cst_5 : f32 to vector<8x4xf32>
    %8 = arith.cmpf one, %0, %7 : vector<8x4xf32>
    %9 = arith.extui %8 : vector<8x4xi1> to vector<8x4xi32>
    %10 = arith.sitofp %9 : vector<8x4xi32> to vector<8x4xf32>
    %11 = arith.mulf %6, %10 : vector<8x4xf32>
    %c0_6 = arith.constant 0 : index
    %c0_7 = arith.constant 0 : index
    %12 = vector.load %arg4[%c0_6, %c0_7] : memref<4x128xf32, #tpu.memory_space<vmem>>, vector<4x128xf32>
    %cst_8 = arith.constant dense<0.000000e+00> : vector<8x128xf32>
    %13 = tpu.matmul %11, %12, %cst_8 {dimension_numbers = #tpu.dot_dimension_numbers<[1], [0], [0], [1], [0, 0, 1, 1], [], []>} : vector<8x4xf32>, vector<4x128xf32>, vector<8x128xf32> -> vector<8x128xf32>
    %c0_9 = arith.constant 0 : index
    %c0_10 = arith.constant 0 : index
    %14 = vector.load %arg5[%c0_9, %c0_10] : memref<4x128xf32, #tpu.memory_space<vmem>>, vector<4x128xf32>
    %cst_11 = arith.constant dense<0.000000e+00> : vector<8x128xf32>
    %15 = tpu.matmul %10, %14, %cst_11 {dimension_numbers = #tpu.dot_dimension_numbers<[1], [0], [0], [1], [0, 0, 1, 1], [], []>} : vector<8x4xf32>, vector<4x128xf32>, vector<8x128xf32> -> vector<8x128xf32>
    %16 = arith.addf %13, %15 : vector<8x128xf32>
    %c0_12 = arith.constant 0 : index
    %c0_13 = arith.constant 0 : index
    %17 = vector.load %arg6[%c0_12, %c0_13] : memref<8x128xf32, #tpu.memory_space<vmem>>, vector<8x128xf32>
    tpu.vector_store %arg6[%c0_12, %c0_13], %16 {strides = array<i32>} : memref<8x128xf32, #tpu.memory_space<vmem>>, vector<8x128xf32>,
    return
  }
  func.func @transform_0(%arg0: i32) -> (i32, i32) {
    %c0_i32 = arith.constant 0 : i32
    %c0_i32_0 = arith.constant 0 : i32
    return %arg0, %c0_i32 : i32, i32
  }
  func.func @transform_1(%arg0: i32) -> (i32, i32) {
    %c0_i32 = arith.constant 0 : i32
    %c0_i32_0 = arith.constant 0 : i32
    return %arg0, %c0_i32 : i32, i32
  }
  func.func @transform_2(%arg0: i32) -> (i32, i32) {
    %c0_i32 = arith.constant 0 : i32
    %c0_i32_0 = arith.constant 0 : i32
    return %arg0, %c0_i32 : i32, i32
  }
  func.func @transform_3(%arg0: i32) -> (i32, i32) {
    %c0_i32 = arith.constant 0 : i32
    %c0_i32_0 = arith.constant 0 : i32
    %c0_i32_1 = arith.constant 0 : i32
    return %c0_i32, %c0_i32_0 : i32, i32
  }
  func.func @transform_4(%arg0: i32) -> (i32, i32) {
    %c0_i32 = arith.constant 0 : i32
    %c0_i32_0 = arith.constant 0 : i32
    %c0_i32_1 = arith.constant 0 : i32
    return %c0_i32, %c0_i32_0 : i32, i32
  }
  func.func @transform_5(%arg0: i32) -> (i32, i32) {
    %c0_i32 = arith.constant 0 : i32
    %c0_i32_0 = arith.constant 0 : i32
    return %arg0, %c0_i32 : i32, i32
  }
}

</mosaic_0001>

<bundles_post_ra>
// kernel: tpu_custom_call.1
= control target key start
LH: loop header
LB: loop body
LE: loop exit
PB: predicated region body
PF: predicated region fallthrough
CT: control target
= control target key end

     0   :  { %vm38_vm0 = vcmask 1043456   ;;  %v252_v2 = vmov 0.0   ;;  %vm253_vm1 = vmmov 0   ;;  %vm34_vm3 = vcmask 31744   ;;  %s316_s0 = inlined_call_operand.vmem [shape: f32[8,4], index: 0, kind: input, shape index: {}]   ;;  %s317_s1 = inlined_call_operand.vmem [shape: f32[8,4], index: 1, kind: input, shape index: {}]   ;;  %s318_s2 = inlined_call_operand.vmem [shape: f32[8,4], index: 2, kind: input, shape index: {}]   ;;  %s319_s3 = inlined_call_operand.vmem [shape: f32[4,128], index: 3, kind: input, shape index: {}]   ;;  %s320_s4 = inlined_call_operand.vmem [shape: f32[4,128], index: 4, kind: input, shape index: {}]   ;;  %s321_s5 = inlined_call_operand.hbm [shape: f32[8,128], index: 5, kind: output, shape index: {}]  }
   0x1   :  { %v33_v0 = vld [vmem:[%s320_s4] sm:$0xf]  ;;  %212 = vmatprep.subr.mxu1 %v252_v2  ;;  %214 = vmatprep.mubr.msk.f32.mxu1 %vm253_vm1, %v252_v2 }
   0x2   :  { %v21_v1 = vld [vmem:[%s316_s0] sm:$0xff]  ;;  %213 = vmatpush3.msk.msra.mxu1 %vm38_vm0, %v33_v0  ;;  %217 = vmatprep.subr.mxu0 %v252_v2 }
   0x3   :  { %v24_v3 = vld [vmem:[%s318_s2] sm:$0xff]  ;;  %vm28_vm2 = vcmp.ne.f32.partialorder %v21_v1, -1.0 }
   0x4   :  { %v32_v4 = vld [vmem:[%s319_s3] sm:$0xf]  ;;  %v25_v5 = vmax.f32 %v24_v3, 1e-06  ;;  %v203_v6 = vsel %vm28_vm2, 1.0, %v252_v2 }
   0x5   :  { %10 = vsyncpa [#allocation3], 0  ;;  %215 = vmatmul.mubr.msk.f32.vlgmr.msra.gmra.mrb[0].mxu1 %vm34_vm3, %v203_v6  ;;  %218 = vmatpush3.msk.msra.mxu0 %vm38_vm0, %v32_v4  ;;  %v22_v7 = vld [vmem:[%s317_s1] sm:$0xff]  ;;  %s254_s3 = smov [#allocation2]  }
   0x6   :  { %226 = vrcp.f32 %v25_v5  ;;  %219 = vmatprep.mubr.msk.f32.mxu0 %vm253_vm1, %v252_v2  ;;  %v23_v8 = vsub.f32 %v21_v1, %v22_v7  ;;  %s195_s4 = sshll.u32 %s254_s3, 4  ;;  %s196_s4 = int_to_ptr.vmem [resolvable:$true] %s195_s4 }
   0x7   :  { %s228_s26 = scalar_lea.vmem %s196_s4, 128  ;;  %p233_p1 = scmp.lt.s32.totalorder %s196_s4, %s196_s4 }
   0x8   :  { %p229_p0 = scmp.ne.s32.totalorder %s196_s4, %s228_s26  ;;  %p234_p2 = scmp.lt.s32.totalorder %s228_s26, %s228_s26 }
   0xa   :  { %p235_p3 = por %p234_p2, %p233_p1 }
   0xc   :  { %p236_p4 = pnand %p235_p3, %p229_p0 }
  0x10   :  { %v227_v9 = vpop.eup %226 }
  0x11   :  { %v27_v10 = vmul.f32 %v227_v9, %v23_v8 }
  0x13   :  { %v31_v11 = vmul.f32 %v203_v6, %v27_v10 }
  0x15   :  { %220 = vmatmul.mubr.msk.f32.vlgmr.msra.gmra.mrb[0].mxu0 %vm34_vm3, %v31_v11 }
  0xd8   :  { %v108_v12 = vpop.f32.mrb[0].mxu1 }
  0xd9   :  { %v216_v13 = vpop.f32.mrb[1].mxu1 }
  0xe8   :  { %v184_v14 = vpop.f32.mrb[0].mxu0 }
  0xe9   :  { %v185_v15 = vadd.f32 %v184_v14, %v108_v12  ;;  %v221_v16 = vpop.f32.mrb[1].mxu0 }
  0xeb   :  { %188 = vst [vmem:[#allocation2] sm:$0xff] %v185_v15 }
  0xec   :  { %239 = shalt.err (!%p236_p4)
}
  0xed   :  { %s240_s28 = scalar_lea.hbm %s321_s5, 128 }
  0xee   :  { %p241_p5 = scmp.ne.s32.totalorder %s321_s5, %s240_s28  ;;  %p244_p6 = scmp.lt.u32.totalorder %s240_s28, %s321_s5 }
  0xf0   :  { %p246_p7 = pnand %p244_p6, %p241_p5 }
  0xf2   :  { %249 = shalt.err (!%p246_p7)
}
  0xf3   :  { %198 = dma.vmem_to_hbm [thread:$0]  %s196_s4, 128, %s321_s5, [#allocation3]  }
  0xf4   :  { %250 = dma.done.wait [#allocation3], 128  }
  0xf5   :  { %251 = vsyncadd [#allocation3], 4294967168 }
  0xf6   :  { %202 = vsyncpa [#allocation3], 1 }

</bundles_post_ra>
